<compile_context>
chip_gen: v7x
topology: tpu7x:2x2x1
jax: 0.10.0
libtpu: 0.0.40
codegen_flags: <defaults>
</compile_context>

<pallas_src>
import math
import jax
import jax.numpy as jnp
from jax.experimental import pallas as pl
from jax.experimental.pallas import tpu as pltpu


def _choose_query_tile(S):
    """Largest convenient query-row tile: full S when small, else a divisor."""
    if S <= 512:
        return S
    for ts in (512, 384, 256, 128, 64, 32, 16, 8):
        if S % ts == 0:
            return ts
    return S


def multi_head_attention(x, wk, wq, wv, conv):
    """x: (B, S, E); wk/wq/wv: (H, E, K/Q/V); conv: (H*V, E). Returns (B, S, E)."""
    B, S, E = x.shape
    H, _, K = wk.shape
    _, _, Q = wq.shape
    _, _, V = wv.shape
    assert Q == K, "module requires querySize == keySize (score matmul)"
    HQ, HK, HV = H * Q, H * K, H * V
    Wtot = HQ + HK + HV

    # Fold the 1/sqrt(seq_len) scale into the query weights (scalar commutes
    # through both matmuls), then fuse all per-head Q/K/V weights into one
    # wide projection matrix: (x @ W)[:, h*D:(h+1)*D] == x @ w*[h].
    scale = 1.0 / (float(int(S)) ** 0.5)
    wq_f = (wq * scale).transpose(1, 0, 2).reshape(E, HQ)
    wk_f = wk.transpose(1, 0, 2).reshape(E, HK)
    wv_f = wv.transpose(1, 0, 2).reshape(E, HV)
    w_qkv = jnp.concatenate([wq_f, wk_f, wv_f], axis=1).astype(jnp.bfloat16)  # (E, Wtot)
    conv_b = conv.astype(jnp.bfloat16)                                        # (HV, E)

    tS = _choose_query_tile(S)
    nS = pl.cdiv(S, tS)   # tS divides S by construction

    def kernel(x_ref, w_ref, c_ref, o_ref, qkv_ref, heads_ref):
        si = pl.program_id(1)

        # Fused QKV projection once per batch element; stored as bf16 so the
        # per-head matmul operands below are native-rate MXU inputs and the
        # f32 projection value dies immediately (no spills across heads).
        @pl.when(si == 0)
        def _():
            xb = x_ref[...].astype(jnp.bfloat16)                       # (S, E)
            qkv = jnp.dot(xb, w_ref[...],
                          preferred_element_type=jnp.float32)          # (S, Wtot)
            qkv_ref[...] = qkv.astype(jnp.bfloat16)

        row0 = pl.multiple_of(si * tS, tS)

        # Static unroll over heads (H is small); all operands are loaded from
        # the bf16 VMEM scratch so each head's live range is bounded.
        for h in range(H):
            q = qkv_ref[pl.ds(row0, tS), h * Q:(h + 1) * Q]            # (tS, Q) bf16
            k = qkv_ref[:, HQ + h * K:HQ + (h + 1) * K]                # (S, K)  bf16
            v = qkv_ref[:, HQ + HK + h * V:HQ + HK + (h + 1) * V]      # (S, V)  bf16

            # Faithful to torch: keys.reshape(K, S) — row-major reshape, NOT a
            # transpose (a pure shape reinterpretation when S == K).
            k_r = k.reshape(K, S)

            s = jnp.dot(q, k_r, preferred_element_type=jnp.float32)    # (tS, S)

            # Numerically stable softmax; normalization deferred past the PV
            # matmul so the broadcast multiply is (tS, V), not (tS, S).
            m = jnp.max(s, axis=-1, keepdims=True)
            e = jnp.exp(s - m)                                         # (tS, S) f32
            head = jnp.dot(e.astype(jnp.bfloat16), v,
                           preferred_element_type=jnp.float32)         # (tS, V)
            inv = pl.reciprocal(jnp.sum(e, axis=-1, keepdims=True),
                                approx=True)                           # (tS, 1) EUP
            heads_ref[:, h * V:(h + 1) * V] = (head * inv).astype(jnp.bfloat16)

        # Fused output projection across all heads: one (tS, HV) @ (HV, E).
        o_ref[...] = jnp.dot(heads_ref[...], c_ref[...],
                             preferred_element_type=jnp.float32).astype(o_ref.dtype)

    flops = B * (2 * S * E * Wtot                         # fused QKV projection
                 + H * (2 * S * K * S + 2 * S * S * V)    # scores + PV per head
                 + 2 * S * HV * E)                        # fused output projection
    transcendentals = B * H * S * S
    bytes_accessed = (B * S * E * 4      # x (f32, read once)
                      + E * Wtot * 2     # fused QKV weights (bf16)
                      + HV * E * 2       # conversion matrix (bf16)
                      + B * S * E * 4)   # output (f32)

    # Explicit VMEM budget only when the working set exceeds the conservative
    # default scoped limit (first hard wall on v5e; relevant on v7x too).
    vmem_est = (2 * S * E * 4 + 2 * E * Wtot * 2 + 2 * HV * E * 2 + 2 * tS * E * 4
                + S * Wtot * 2 + tS * HV * 2
                + S * Wtot * 4 + 2 * tS * S * 4 + tS * HV * 4)
    compiler_kwargs = dict(dimension_semantics=("parallel", "arbitrary"))
    if vmem_est > (12 << 20):
        compiler_kwargs["vmem_limit_bytes"] = min(int(1.5 * vmem_est), 56 << 20)

    out = pl.pallas_call(
        kernel,
        out_shape=jax.ShapeDtypeStruct((B, S, E), x.dtype),
        grid_spec=pltpu.PrefetchScalarGridSpec(
            num_scalar_prefetch=0,
            grid=(B, nS),
            in_specs=[
                # full-S activation block, constant along the query-tile axis
                pl.BlockSpec((None, S, E), lambda b, si: (b, 0, 0)),
                # fused QKV weights: constant index_map -> VMEM-resident
                pl.BlockSpec((E, Wtot), lambda b, si: (0, 0)),
                # conversion matrix: constant index_map -> VMEM-resident
                pl.BlockSpec((HV, E), lambda b, si: (0, 0)),
            ],
            out_specs=pl.BlockSpec((None, tS, E), lambda b, si: (b, si, 0)),
            scratch_shapes=[
                pltpu.VMEM((S, Wtot), jnp.bfloat16),   # bf16 QKV projection
                pltpu.VMEM((tS, HV), jnp.bfloat16),    # per-tile fused heads
            ],
        ),
        compiler_params=pltpu.CompilerParams(**compiler_kwargs),
        cost_estimate=pl.CostEstimate(flops=flops,
                                      transcendentals=transcendentals,
                                      bytes_accessed=bytes_accessed),
    )(x, w_qkv, conv_b)

    return out


def reference(x, wk, wq, wv, conv):
    """Pure-JAX f32 mirror of the PyTorch forward (for verification)."""
    B, S, E = x.shape
    H = wk.shape[0]
    outs = []
    for h in range(H):
        keys = x @ wk[h]                                          # (B, S, K)
        queries = x @ wq[h]                                       # (B, S, Q)
        values = x @ wv[h]                                        # (B, S, V)
        keys_r = keys.reshape(B, keys.shape[2], keys.shape[1])    # reshape, not transpose
        scores = jnp.matmul(queries, keys_r) / (int(S) ** 0.5)
        p = jax.nn.softmax(scores, axis=-1)
        outs.append(jnp.matmul(p, values))
    attention = jnp.concatenate(outs, axis=-1)                    # (B, S, H*V)
    return attention @ conv                                        # (B, S, E)


if __name__ == "__main__":
    # Small, deterministic setup consistent with the module's __init__.
    B, S = 2, 8
    embeddingSize = 32
    numHeads = 4
    keySize = querySize = 8   # Q must equal K for the score matmul to be valid
    valueSize = 8

    key = jax.random.PRNGKey(0)
    k_sqrt = math.sqrt(1.0 / embeddingSize)
    kx, kk, kq, kv, kc = jax.random.split(key, 5)

    x = jax.random.normal(kx, (B, S, embeddingSize), dtype=jnp.float32)
    wk = jax.random.uniform(kk, (numHeads, embeddingSize, keySize),
                            minval=-k_sqrt, maxval=k_sqrt, dtype=jnp.float32)
    wq = jax.random.uniform(kq, (numHeads, embeddingSize, querySize),
                            minval=-k_sqrt, maxval=k_sqrt, dtype=jnp.float32)
    wv = jax.random.uniform(kv, (numHeads, embeddingSize, valueSize),
                            minval=-k_sqrt, maxval=k_sqrt, dtype=jnp.float32)
    conv = jax.random.uniform(kc, (numHeads * valueSize, embeddingSize),
                              minval=-k_sqrt, maxval=k_sqrt, dtype=jnp.float32)

    out = multi_head_attention(x, wk, wq, wv, conv)
    out = jax.block_until_ready(out)

    ref = reference(x, wk, wq, wv, conv)
    assert out.shape == (B, S, embeddingSize)
    # bf16 MXU operands + approx reciprocal -> loosened tolerance vs f32 reference.
    assert jnp.allclose(out, ref, atol=5e-2, rtol=5e-2), "mismatch vs reference"

    print("KERNEL_OK")
</pallas_src>

<mosaic_0001>
module attributes {stable_mosaic.version = 11 : i64} {
  func.func @kernel(%arg0: i32, %arg1: i32, %arg2: memref<1x8x32xf32, #tpu.memory_space<vmem>>, %arg3: memref<32x96xbf16, #tpu.memory_space<vmem>>, %arg4: memref<32x32xbf16, #tpu.memory_space<vmem>>, %arg5: memref<1x8x32xf32, #tpu.memory_space<vmem>>, %arg6: memref<8x96xbf16, #tpu.memory_space<vmem>>, %arg7: memref<8x32xbf16, #tpu.memory_space<vmem>>) attributes {dimension_semantics = [#tpu.dimension_semantics<parallel>, #tpu.dimension_semantics<arbitrary>], iteration_bounds = array<i64: 2, 1>, scalar_prefetch = 0 : i64, scratch_operands = 2 : i64, tpu.core_type = #tpu.core_type<tc>, window_params = [{transform_indices = @transform_0, window_bounds = array<i64: 1, 8, 32>}, {pipeline_mode = #tpu.pipeline_mode<synchronous>, transform_indices = @transform_1, window_bounds = array<i64: 32, 96>}, {pipeline_mode = #tpu.pipeline_mode<synchronous>, transform_indices = @transform_2, window_bounds = array<i64: 32, 32>}, {transform_indices = @transform_3, window_bounds = array<i64: 1, 8, 32>}]} {
    %c0_i32 = arith.constant 0 : i32
    %0 = arith.cmpi eq, %arg1, %c0_i32 : i32
    %1 = arith.extui %0 : i1 to i32
    %c0_i32_0 = arith.constant 0 : i32
    %2 = arith.cmpi ne, %1, %c0_i32_0 : i32
    scf.if %2 {
      %c0_40 = arith.constant 0 : index
      %c0_41 = arith.constant 0 : index
      %c0_42 = arith.constant 0 : index
      %87 = vector.load %arg2[%c0_40, %c0_41, %c0_42] : memref<1x8x32xf32, #tpu.memory_space<vmem>>, vector<1x8x32xf32>
      %88 = vector.shape_cast %87 : vector<1x8x32xf32> to vector<8x32xf32>
      %89 = arith.truncf %88 : vector<8x32xf32> to vector<8x32xbf16>
      %c0_43 = arith.constant 0 : index
      %c0_44 = arith.constant 0 : index
      %90 = vector.load %arg3[%c0_43, %c0_44] : memref<32x96xbf16, #tpu.memory_space<vmem>>, vector<32x96xbf16>
      %cst_45 = arith.constant dense<0.000000e+00> : vector<8x96xf32>
      %91 = tpu.matmul %89, %90, %cst_45 {dimension_numbers = #tpu.dot_dimension_numbers<[1], [0], [0], [1], [0, 0, 1, 1], [], []>} : vector<8x32xbf16>, vector<32x96xbf16>, vector<8x96xf32> -> vector<8x96xf32>
      %92 = arith.truncf %91 : vector<8x96xf32> to vector<8x96xbf16>
      %c0_46 = arith.constant 0 : index
      %c0_47 = arith.constant 0 : index
      %93 = vector.load %arg6[%c0_46, %c0_47] : memref<8x96xbf16, #tpu.memory_space<vmem>>, vector<8x96xbf16>
      tpu.vector_store %arg6[%c0_46, %c0_47], %92 {strides = array<i32>} : memref<8x96xbf16, #tpu.memory_space<vmem>>, vector<8x96xbf16>,
    } else {
    }
    %c8_i32 = arith.constant 8 : i32
    %3 = arith.muli %arg1, %c8_i32 : i32
    %4 = tpu.assume_multiple %3, 8 : i32
    %5 = arith.index_cast %4 : i32 to index
    %c0 = arith.constant 0 : index
    %6 = vector.load %arg6[%5, %c0] : memref<8x96xbf16, #tpu.memory_space<vmem>>, vector<8x8xbf16>
    %c0_1 = arith.constant 0 : index
    %c32 = arith.constant 32 : index
    %7 = vector.load %arg6[%c0_1, %c32] : memref<8x96xbf16, #tpu.memory_space<vmem>>, vector<8x8xbf16>
    %c0_2 = arith.constant 0 : index
    %c64 = arith.constant 64 : index
    %8 = vector.load %arg6[%c0_2, %c64] : memref<8x96xbf16, #tpu.memory_space<vmem>>, vector<8x8xbf16>
    %cst = arith.constant dense<0.000000e+00> : vector<8x8xf32>
    %9 = tpu.matmul %6, %7, %cst {dimension_numbers = #tpu.dot_dimension_numbers<[1], [0], [0], [1], [0, 0, 1, 1], [], []>} : vector<8x8xbf16>, vector<8x8xbf16>, vector<8x8xf32> -> vector<8x8xf32>
    %cst_3 = arith.constant dense<0xFF800000> : vector<8xf32>
    %10 = vector.multi_reduction <maximumf>, %9, %cst_3 [1] : vector<8x8xf32> to vector<8xf32>
    %11 = vector.shape_cast %10 : vector<8xf32> to vector<8x1xf32>
    %12 = vector.broadcast %11 : vector<8x1xf32> to vector<8x8xf32>
    %13 = arith.subf %9, %12 : vector<8x8xf32>
    %14 = math.exp %13 : vector<8x8xf32>
    %15 = arith.truncf %14 : vector<8x8xf32> to vector<8x8xbf16>
    %cst_4 = arith.constant dense<0.000000e+00> : vector<8x8xf32>
    %16 = tpu.matmul %15, %8, %cst_4 {dimension_numbers = #tpu.dot_dimension_numbers<[1], [0], [0], [1], [0, 0, 1, 1], [], []>} : vector<8x8xbf16>, vector<8x8xbf16>, vector<8x8xf32> -> vector<8x8xf32>
    %cst_5 = arith.constant dense<0.000000e+00> : vector<8xf32>
    %17 = vector.multi_reduction <add>, %14, %cst_5 [1] : vector<8x8xf32> to vector<8xf32>
    %18 = vector.shape_cast %17 : vector<8xf32> to vector<8x1xf32>
    %19 = tpu.reciprocal %18 {approx = true} : vector<8x1xf32> -> vector<8x1xf32>
    %20 = vector.broadcast %19 : vector<8x1xf32> to vector<8x8xf32>
    %21 = arith.mulf %16, %20 : vector<8x8xf32>
    %22 = arith.truncf %21 : vector<8x8xf32> to vector<8x8xbf16>
    %c0_6 = arith.constant 0 : index
    %c0_7 = arith.constant 0 : index
    %23 = vector.load %arg7[%c0_6, %c0_7] : memref<8x32xbf16, #tpu.memory_space<vmem>>, vector<8x8xbf16>
    tpu.vector_store %arg7[%c0_6, %c0_7], %22 {strides = array<i32>} : memref<8x32xbf16, #tpu.memory_space<vmem>>, vector<8x8xbf16>,
    %24 = arith.index_cast %4 : i32 to index
    %c8 = arith.constant 8 : index
    %25 = vector.load %arg6[%24, %c8] : memref<8x96xbf16, #tpu.memory_space<vmem>>, vector<8x8xbf16>
    %c0_8 = arith.constant 0 : index
    %c40 = arith.constant 40 : index
    %26 = vector.load %arg6[%c0_8, %c40] : memref<8x96xbf16, #tpu.memory_space<vmem>>, vector<8x8xbf16>
    %c0_9 = arith.constant 0 : index
    %c72 = arith.constant 72 : index
    %27 = vector.load %arg6[%c0_9, %c72] : memref<8x96xbf16, #tpu.memory_space<vmem>>, vector<8x8xbf16>
    %cst_10 = arith.constant dense<0.000000e+00> : vector<8x8xf32>
    %28 = tpu.matmul %25, %26, %cst_10 {dimension_numbers = #tpu.dot_dimension_numbers<[1], [0], [0], [1], [0, 0, 1, 1], [], []>} : vector<8x8xbf16>, vector<8x8xbf16>, vector<8x8xf32> -> vector<8x8xf32>
    %cst_11 = arith.constant dense<0xFF800000> : vector<8xf32>
    %29 = vector.multi_reduction <maximumf>, %28, %cst_11 [1] : vector<8x8xf32> to vector<8xf32>
    %30 = vector.shape_cast %29 : vector<8xf32> to vector<8x1xf32>
    %31 = vector.broadcast %30 : vector<8x1xf32> to vector<8x8xf32>
    %32 = arith.subf %28, %31 : vector<8x8xf32>
    %33 = math.exp %32 : vector<8x8xf32>
    %34 = arith.truncf %33 : vector<8x8xf32> to vector<8x8xbf16>
    %cst_12 = arith.constant dense<0.000000e+00> : vector<8x8xf32>
    %35 = tpu.matmul %34, %27, %cst_12 {dimension_numbers = #tpu.dot_dimension_numbers<[1], [0], [0], [1], [0, 0, 1, 1], [], []>} : vector<8x8xbf16>, vector<8x8xbf16>, vector<8x8xf32> -> vector<8x8xf32>
    %cst_13 = arith.constant dense<0.000000e+00> : vector<8xf32>
    %36 = vector.multi_reduction <add>, %33, %cst_13 [1] : vector<8x8xf32> to vector<8xf32>
    %37 = vector.shape_cast %36 : vector<8xf32> to vector<8x1xf32>
    %38 = tpu.reciprocal %37 {approx = true} : vector<8x1xf32> -> vector<8x1xf32>
    %39 = vector.broadcast %38 : vector<8x1xf32> to vector<8x8xf32>
    %40 = arith.mulf %35, %39 : vector<8x8xf32>
    %41 = arith.truncf %40 : vector<8x8xf32> to vector<8x8xbf16>
    %c0_14 = arith.constant 0 : index
    %c8_15 = arith.constant 8 : index
    %42 = vector.load %arg7[%c0_14, %c8_15] : memref<8x32xbf16, #tpu.memory_space<vmem>>, vector<8x8xbf16>
    tpu.vector_store %arg7[%c0_14, %c8_15], %41 {strides = array<i32>} : memref<8x32xbf16, #tpu.memory_space<vmem>>, vector<8x8xbf16>,
    %43 = arith.index_cast %4 : i32 to index
    %c16 = arith.constant 16 : index
    %44 = vector.load %arg6[%43, %c16] : memref<8x96xbf16, #tpu.memory_space<vmem>>, vector<8x8xbf16>
    %c0_16 = arith.constant 0 : index
    %c48 = arith.constant 48 : index
    %45 = vector.load %arg6[%c0_16, %c48] : memref<8x96xbf16, #tpu.memory_space<vmem>>, vector<8x8xbf16>
    %c0_17 = arith.constant 0 : index
    %c80 = arith.constant 80 : index
    %46 = vector.load %arg6[%c0_17, %c80] : memref<8x96xbf16, #tpu.memory_space<vmem>>, vector<8x8xbf16>
    %cst_18 = arith.constant dense<0.000000e+00> : vector<8x8xf32>
    %47 = tpu.matmul %44, %45, %cst_18 {dimension_numbers = #tpu.dot_dimension_numbers<[1], [0], [0], [1], [0, 0, 1, 1], [], []>} : vector<8x8xbf16>, vector<8x8xbf16>, vector<8x8xf32> -> vector<8x8xf32>
    %cst_19 = arith.constant dense<0xFF800000> : vector<8xf32>
    %48 = vector.multi_reduction <maximumf>, %47, %cst_19 [1] : vector<8x8xf32> to vector<8xf32>
    %49 = vector.shape_cast %48 : vector<8xf32> to vector<8x1xf32>
    %50 = vector.broadcast %49 : vector<8x1xf32> to vector<8x8xf32>
    %51 = arith.subf %47, %50 : vector<8x8xf32>
    %52 = math.exp %51 : vector<8x8xf32>
    %53 = arith.truncf %52 : vector<8x8xf32> to vector<8x8xbf16>
    %cst_20 = arith.constant dense<0.000000e+00> : vector<8x8xf32>
    %54 = tpu.matmul %53, %46, %cst_20 {dimension_numbers = #tpu.dot_dimension_numbers<[1], [0], [0], [1], [0, 0, 1, 1], [], []>} : vector<8x8xbf16>, vector<8x8xbf16>, vector<8x8xf32> -> vector<8x8xf32>
    %cst_21 = arith.constant dense<0.000000e+00> : vector<8xf32>
    %55 = vector.multi_reduction <add>, %52, %cst_21 [1] : vector<8x8xf32> to vector<8xf32>
    %56 = vector.shape_cast %55 : vector<8xf32> to vector<8x1xf32>
    %57 = tpu.reciprocal %56 {approx = true} : vector<8x1xf32> -> vector<8x1xf32>
    %58 = vector.broadcast %57 : vector<8x1xf32> to vector<8x8xf32>
    %59 = arith.mulf %54, %58 : vector<8x8xf32>
    %60 = arith.truncf %59 : vector<8x8xf32> to vector<8x8xbf16>
    %c0_22 = arith.constant 0 : index
    %c16_23 = arith.constant 16 : index
    %61 = vector.load %arg7[%c0_22, %c16_23] : memref<8x32xbf16, #tpu.memory_space<vmem>>, vector<8x8xbf16>
    tpu.vector_store %arg7[%c0_22, %c16_23], %60 {strides = array<i32>} : memref<8x32xbf16, #tpu.memory_space<vmem>>, vector<8x8xbf16>,
    %62 = arith.index_cast %4 : i32 to index
    %c24 = arith.constant 24 : index
    %63 = vector.load %arg6[%62, %c24] : memref<8x96xbf16, #tpu.memory_space<vmem>>, vector<8x8xbf16>
    %c0_24 = arith.constant 0 : index
    %c56 = arith.constant 56 : index
    %64 = vector.load %arg6[%c0_24, %c56] : memref<8x96xbf16, #tpu.memory_space<vmem>>, vector<8x8xbf16>
    %c0_25 = arith.constant 0 : index
    %c88 = arith.constant 88 : index
    %65 = vector.load %arg6[%c0_25, %c88] : memref<8x96xbf16, #tpu.memory_space<vmem>>, vector<8x8xbf16>
    %cst_26 = arith.constant dense<0.000000e+00> : vector<8x8xf32>
    %66 = tpu.matmul %63, %64, %cst_26 {dimension_numbers = #tpu.dot_dimension_numbers<[1], [0], [0], [1], [0, 0, 1, 1], [], []>} : vector<8x8xbf16>, vector<8x8xbf16>, vector<8x8xf32> -> vector<8x8xf32>
    %cst_27 = arith.constant dense<0xFF800000> : vector<8xf32>
    %67 = vector.multi_reduction <maximumf>, %66, %cst_27 [1] : vector<8x8xf32> to vector<8xf32>
    %68 = vector.shape_cast %67 : vector<8xf32> to vector<8x1xf32>
    %69 = vector.broadcast %68 : vector<8x1xf32> to vector<8x8xf32>
    %70 = arith.subf %66, %69 : vector<8x8xf32>
    %71 = math.exp %70 : vector<8x8xf32>
    %72 = arith.truncf %71 : vector<8x8xf32> to vector<8x8xbf16>
    %cst_28 = arith.constant dense<0.000000e+00> : vector<8x8xf32>
    %73 = tpu.matmul %72, %65, %cst_28 {dimension_numbers = #tpu.dot_dimension_numbers<[1], [0], [0], [1], [0, 0, 1, 1], [], []>} : vector<8x8xbf16>, vector<8x8xbf16>, vector<8x8xf32> -> vector<8x8xf32>
    %cst_29 = arith.constant dense<0.000000e+00> : vector<8xf32>
    %74 = vector.multi_reduction <add>, %71, %cst_29 [1] : vector<8x8xf32> to vector<8xf32>
    %75 = vector.shape_cast %74 : vector<8xf32> to vector<8x1xf32>
    %76 = tpu.reciprocal %75 {approx = true} : vector<8x1xf32> -> vector<8x1xf32>
    %77 = vector.broadcast %76 : vector<8x1xf32> to vector<8x8xf32>
    %78 = arith.mulf %73, %77 : vector<8x8xf32>
    %79 = arith.truncf %78 : vector<8x8xf32> to vector<8x8xbf16>
    %c0_30 = arith.constant 0 : index
    %c24_31 = arith.constant 24 : index
    %80 = vector.load %arg7[%c0_30, %c24_31] : memref<8x32xbf16, #tpu.memory_space<vmem>>, vector<8x8xbf16>
    tpu.vector_store %arg7[%c0_30, %c24_31], %79 {strides = array<i32>} : memref<8x32xbf16, #tpu.memory_space<vmem>>, vector<8x8xbf16>,
    %c0_32 = arith.constant 0 : index
    %c0_33 = arith.constant 0 : index
    %81 = vector.load %arg7[%c0_32, %c0_33] : memref<8x32xbf16, #tpu.memory_space<vmem>>, vector<8x32xbf16>
    %c0_34 = arith.constant 0 : index
    %c0_35 = arith.constant 0 : index
    %82 = vector.load %arg4[%c0_34, %c0_35] : memref<32x32xbf16, #tpu.memory_space<vmem>>, vector<32x32xbf16>
    %cst_36 = arith.constant dense<0.000000e+00> : vector<8x32xf32>
    %83 = tpu.matmul %81, %82, %cst_36 {dimension_numbers = #tpu.dot_dimension_numbers<[1], [0], [0], [1], [0, 0, 1, 1], [], []>} : vector<8x32xbf16>, vector<32x32xbf16>, vector<8x32xf32> -> vector<8x32xf32>
    %c0_37 = arith.constant 0 : index
    %c0_38 = arith.constant 0 : index
    %c0_39 = arith.constant 0 : index
    %84 = vector.load %arg5[%c0_37, %c0_38, %c0_39] : memref<1x8x32xf32, #tpu.memory_space<vmem>>, vector<1x8x32xf32>
    %85 = vector.shape_cast %84 : vector<1x8x32xf32> to vector<8x32xf32>
    %86 = vector.shape_cast %83 : vector<8x32xf32> to vector<1x8x32xf32>
    tpu.vector_store %arg5[%c0_37, %c0_38, %c0_39], %86 {strides = array<i32>} : memref<1x8x32xf32, #tpu.memory_space<vmem>>, vector<1x8x32xf32>,
    return
  }
  func.func @transform_0(%arg0: i32, %arg1: i32) -> (i32, i32, i32) {
    %c0_i32 = arith.constant 0 : i32
    %c0_i32_0 = arith.constant 0 : i32
    %c0_i32_1 = arith.constant 0 : i32
    return %arg0, %c0_i32, %c0_i32_0 : i32, i32, i32
  }
  func.func @transform_1(%arg0: i32, %arg1: i32) -> (i32, i32) {
    %c0_i32 = arith.constant 0 : i32
    %c0_i32_0 = arith.constant 0 : i32
    %c0_i32_1 = arith.constant 0 : i32
    return %c0_i32, %c0_i32_0 : i32, i32
  }
  func.func @transform_2(%arg0: i32, %arg1: i32) -> (i32, i32) {
    %c0_i32 = arith.constant 0 : i32
    %c0_i32_0 = arith.constant 0 : i32
    %c0_i32_1 = arith.constant 0 : i32
    return %c0_i32, %c0_i32_0 : i32, i32
  }
  func.func @transform_3(%arg0: i32, %arg1: i32) -> (i32, i32, i32) {
    %c0_i32 = arith.constant 0 : i32
    %c0_i32_0 = arith.constant 0 : i32
    return %arg0, %arg1, %c0_i32 : i32, i32, i32
  }
}

</mosaic_0001>

<bundles_post_ra>
// kernel: tpu_custom_call.1
= control target key start
LH: loop header
LB: loop body
LE: loop exit
PB: predicated region body
PF: predicated region fallthrough
CT: control target
= control target key end

     0   :  { %8 = vsyncpa [#allocation5], 0  ;;  %s1779_s0 = inlined_call_operand.hbm [shape: f32[2,8,32], index: 0, kind: input, shape index: {}]   ;;  %s1780_s1 = inlined_call_operand.hbm [shape: bf16[32,96], index: 1, kind: input, shape index: {}]   ;;  %s1781_s2 = inlined_call_operand.hbm [shape: bf16[32,32], index: 2, kind: input, shape index: {}]   ;;  %s1782_s3 = inlined_call_operand.hbm [shape: f32[2,8,32], index: 3, kind: output, shape index: {}]  }
   0x1   :  { %10 = vsyncpa [#allocation5 + $0x1], 0 }
   0x2   :  { %11 = vsyncpa [#allocation8], 0 }
   0x3   :  { %12 = vsyncpa [#allocation6], 0 }
   0x4   :  { %14 = vsyncpa [#allocation6 + $0x1], 0  ;;  %s1454_s12 = smov 0   ;;  %s1456_s13 = smov 0  }
   0x5   :  { %s1458_s14 = smov 0   ;;  %s1460_s15 = smov 0  }
   0x6   :  { %s1462_s16 = smov 0   ;;  %s1464_s17 = smov 0  }
   0x7 LB: > { %s980_s18 = sadd.s32 4294967295, %s1410_s17   ;;  %s981_s19 = sadd.s32 4294967294, %s1410_s17   ;;  %s1410_s17 = sphi %s1464_s17, %s20_s17   ;;  %s1406_s16 = sphi %s1462_s16, %s1804_s16   ;;  %s1402_s15 = sphi %s1460_s15, %s1803_s15   ;;  %s1398_s14 = sphi %s1458_s14, %s1802_s14   ;;  %s1394_s13 = sphi %s1456_s13, %s1801_s13   ;;  %s1390_s12 = sphi %s1454_s12, %s1800_s12  }
   0x8   : > { %p52_p0 = scmp.ne.s32.totalorder %s1394_s13, %s1390_s12  ;;  %p1488_p1 = scmp.eq.s32.totalorder %s980_s18, 0 }
   0x9   : > { %p1492_p2 = scmp.eq.s32.totalorder %s980_s18, 1  ;;  %p126_p3 = scmp.eq.s32.totalorder %s981_s19, 1 }
   0xa   : > { %s1787_s20 = scalar_select %p1488_p1, 1, 0 }
   0xb   : > { %p1498_p4 = por %p1488_p1, %p52_p0  ;;  %p982_p5 = scmp.ge.s32.totalorder %s1410_s17, 1 }
   0xc   : > { %p1503_p6 = por %p126_p3, %p52_p0  ;;  %p133_p7 = scmp.lt.s32.totalorder %s1410_s17, 3 }
   0xd   : > { %s1789_s22 = scalar_select %p1498_p4, 1, 0 }
   0xe   : > { %s1790_s23 = scalar_select %p1503_p6, 1, 0 }
   0xf   : > { %p1508_p8 = pnand %p982_p5, %p133_p7  ;;  %s1412_s25 = smov [#allocation7]  }
  0x10   : > { %s145_s26 = sshll.u32 %s1412_s25, 4  ;;  %s1413_s28 = smov [#allocation9]   ;;  %s1512_s26 = int_to_ptr.vmem [resolvable:$true] %s145_s26 }
  0x11   : > { %p1122_p9 = pneg %p1508_p8  ;;  %s158_s29 = sshll.u32 %s1413_s28, 4  ;;  %s1523_s29 = int_to_ptr.vmem [resolvable:$true] %s158_s29 }
  0x12   : > { %s1238_s5 = scalar_lea.hbm %s1780_s1, 256 }
  0x13   : > { %p1519_p11 = pnand %p1122_p9, %p1488_p1  ;;  %p1239_p12 = scmp.ne.s32.totalorder %s1780_s1, %s1238_s5 }
  0x14   : > { %p1245_p5 = scmp.lt.u32.totalorder %s1238_s5, %s1780_s1 }
  0x15   : > { %p1240_p13 = pneg %p1519_p11 }
  0x17   : > { %p1241_p0 = pnand %p1240_p13, %p1239_p12 }
  0x19   : > { %p1242_p3 = pneg %p1241_p0 }
  0x1b   : > { %p1247_p7 = pnand %p1245_p5, %p1242_p3 }
  0x1d   : > { %1250 = shalt.err (!%p1247_p7)
}
  0x1e   : > { %s1251_s10 = scalar_lea.vmem %s1512_s26, 256  ;;  %p1259_p1 = scmp.lt.s32.totalorder %s1512_s26, %s1512_s26 }
  0x1f   : > { %p1252_p9 = scmp.ne.s32.totalorder %s1512_s26, %s1251_s10  ;;  %p1260_p12 = scmp.lt.s32.totalorder %s1251_s10, %s1251_s10 }
  0x21   : > { %p1254_p10 = pnand %p1252_p9, %p1240_p13  ;;  %p1261_p0 = por %p1260_p12, %p1259_p1 }
  0x23   : > { %p1255_p6 = pneg %p1254_p10 }
  0x25   : > { %p1262_p4 = pnand %p1261_p0, %p1255_p6 }
  0x27   : > { %1265 = shalt.err (!%p1262_p4)
}
  0x28   : > { %s1414_s11 = smov 64   ;;  %s1415_s18 = smov 4  }
  0x29   : > { %1125 = dma.hbm_to_vmem [thread:$0]  (!%p1519_p11), %s1780_s1, 256, %s1512_s26, [#allocation8], %s1414_s11, %s1414_s11, %s1415_s18  }
  0x2a   : > { %s1266_s4 = scalar_lea.hbm %s1781_s2, 256 }
  0x2b   : > { %p1267_p1 = scmp.ne.s32.totalorder %s1781_s2, %s1266_s4  ;;  %p1273_p10 = scmp.lt.u32.totalorder %s1266_s4, %s1781_s2 }
  0x2d   : > { %p1269_p4 = pnand %p1267_p1, %p1240_p13 }
  0x2f   : > { %p1270_p6 = pneg %p1269_p4 }
  0x31   : > { %p1275_p3 = pnand %p1273_p10, %p1270_p6 }
  0x33   : > { %1278 = shalt.err (!%p1275_p3)
}
  0x34   : > { %s1279_s26 = scalar_lea.vmem %s1523_s29, 256  ;;  %p1287_p12 = scmp.lt.s32.totalorder %s1523_s29, %s1523_s29 }
  0x35   : > { %p1280_p5 = scmp.ne.s32.totalorder %s1523_s29, %s1279_s26  ;;  %p1288_p0 = scmp.lt.s32.totalorder %s1279_s26, %s1279_s26 }
  0x37   : > { %p1282_p7 = pnand %p1280_p5, %p1240_p13  ;;  %p1289_p1 = por %p1288_p0, %p1287_p12 }
  0x39   : > { %p1283_p9 = pneg %p1282_p7 }
  0x3b   : > { %p1290_p4 = pnand %p1289_p1, %p1283_p9 }
  0x3d   : > { %1293 = shalt.err (!%p1290_p4)
}
  0x3e   : > { %1128 = dma.hbm_to_vmem [thread:$0]  (!%p1519_p11), %s1781_s2, 256, %s1523_s29, [#allocation8], %s1414_s11, %s1414_s11, %s1415_s18  }
  0x3f   : > { %s32_s19 = sadd.s32 1, %s1406_s16  ;;  %s39_s25 = sadd.s32 1, %s1398_s14 }
  0x40   : > { %p34_p13 = scmp.ge.s32.totalorder %s32_s19, 2  ;;  %p46_p6 = scmp.ne.s32.totalorder %s1398_s14, %s1394_s13 }
  0x41   : > { %p47_p10 = scmp.eq.s32.totalorder %s1410_s17, 0  ;;  %p1139_p3 = scmp.lt.s32.totalorder %s1410_s17, 2 }
  0x42   : > { %s1806_s19 = smov (%p34_p13, %s32_s19), 0  ;;  %p1587_p7 = por %p1492_p2, %p46_p6 }
  0x43   : > { %p48_p5 = por %p47_p10, %p46_p6  ;;  %s36_s28 = ssub.s32 %s1406_s16, %s1806_s19 }
  0x44   : > { %s1793_s27 = scalar_select %p1587_p7, 1, 0 }
  0x45   : > { %s172_s30 = sand.u32 1, %s1398_s14   ;;  %p37_p9 = scmp.eq.s32.totalorder %s36_s28, 0 }
  0x46   : > { %s986_s29 = sshll.u32 %s172_s30, 3  ;;  %s987_s11 = sshll.u32 %s1406_s16, 7 }
  0x47   : > { %s1596_s18 = scalar_select %p37_p9, %s1398_s14, %s39_s25  }
  0x48   : > { %s1601_s6 = scalar_lea.hbm %s1779_s0, %s987_s11  ;;  %s176_s21 = scalar_lea.vmem [#allocation4], %s986_s29 }
  0x49   : > { %s183_s7 = sshll.u32 %s176_s21, 4  ;;  %p1605_p2 = pnand %p1139_p3, %p48_p5  ;;  %s1609_s7 = int_to_ptr.vmem [resolvable:$true] %s183_s7 }
  0x4a   : > { %s173_s26 = scalar_lea.sflag [#allocation5], %s172_s30  ;;  %s1294_s9 = scalar_lea.hbm %s1601_s6, 128 }
  0x4b   : > { %p1295_p11 = scmp.ne.s32.totalorder %s1601_s6, %s1294_s9  ;;  %p1296_p12 = pneg %p1605_p2 }
  0x4c   : > { %s1299_s28 = scalar_lea.hbm %s1779_s0, 256  ;;  %p1300_p4 = scmp.lt.u32.totalorder %s1601_s6, %s1779_s0 }
  0x4d   : > { %p1297_p0 = pnand %p1296_p12, %p1295_p11  ;;  %p1301_p13 = scmp.lt.u32.totalorder %s1299_s28, %s1294_s9 }
  0x4e   : > { %p1303_p10 = scmp.lt.u32.totalorder %s1294_s9, %s1601_s6 }
  0x4f   : > { %p1298_p1 = pneg %p1297_p0  ;;  %p1302_p6 = por %p1301_p13, %p1300_p4 }
  0x51   : > { %p1304_p3 = por %p1303_p10, %p1302_p6 }
  0x53   : > { %p1305_p5 = pnand %p1304_p3, %p1298_p1 }
  0x55   : > { %1308 = shalt.err (!%p1305_p5)
}
  0x56   : > { %s1309_s30 = scalar_lea.vmem %s1609_s7, 128  ;;  %s1416_s4 = smov [#allocation4]  }
  0x57   : > { %p1310_p9 = scmp.ne.s32.totalorder %s1609_s7, %s1309_s30  ;;  %s1314_s5 = sshll.u32 %s1416_s4, 4  ;;  %s1315_s5 = int_to_ptr.vmem [resolvable:$false] %s1314_s5 }
  0x58   : > { %s1316_s21 = scalar_lea.vmem %s1315_s5, 256  ;;  %p1317_p7 = scmp.lt.s32.totalorder %s1609_s7, %s1315_s5 }
  0x59   : > { %p1312_p11 = pnand %p1310_p9, %p1296_p12  ;;  %p1318_p4 = scmp.lt.s32.totalorder %s1316_s21, %s1309_s30 }
  0x5b   : > { %p1313_p0 = pneg %p1312_p11  ;;  %p1319_p13 = por %p1318_p4, %p1317_p7 }
  0x5d   : > { %p1320_p6 = pnand %p1319_p13, %p1313_p0 }
  0x5f   : > { %1323 = shalt.err (!%p1320_p6)
}
  0x60   : > { %1132 = dma.hbm_to_vmem [thread:$0]  (!%p1605_p2), %s1601_s6, 128, %s1609_s7, %s173_s26  }
  0x61   : > { %192 = sbr.rel (%p1508_p8) target bundleno = 1451 (0x5ab), region = 32  ;;  %s1639_s9 = sand.u32 (!%p1508_p8), 1, %s1394_s13  }
  0x62   : > { %s989_s10 = sshll.u32 (!%p1508_p8), %s1639_s9, 3  ;;  %s195_s25 = scalar_lea.sflag (!%p1508_p8), [#allocation5], %s1639_s9 }
  0x63   : > { %s198_s28 = scalar_lea.vmem (!%p1508_p8), [#allocation4], %s989_s10  ;;  %p1795_p7 = scmp.ne.s32.totalorder (!%p1508_p8), %s1789_s22, 0 }
  0x68   : > { %1377 = dma.done.wait (%p1795_p7), %s195_s25, 128  }
  0x69   : > { %1379 = vsyncadd (%p1795_p7), %s195_s25, 4294967168  ;;  %p1796_p2 = scmp.ne.s32.totalorder %s1787_s20, 0 }
  0x6b   : > { %1381 = dma.done.wait (%p1796_p2), [#allocation8], 512  }
  0x6c   : > { %1383 = vsyncadd (%p1796_p2), [#allocation8], 4294966784  ;;  %v1417_v0 = vmov 0.0   ;;  %vm1418_vm0 = vmmov 0   ;;  %v1211_v1 = vld [vmem:[#allocation7] sm:$0xff]   ;;  %v1212_v2 = vld [vmem:[#allocation7 + $0x8] sm:$0xff]  }
  0x6d   : > { %1046 = vmatprep.subr.bf16.mxu0 %v1417_v0  ;;  %1050 = vmatprep.mubr.msk.bf16.mxu0 %vm1418_vm0, %v1417_v0  ;;  %v234_v3 = vld [vmem:[%s198_s28] sm:$0xff]  ;;  %vm252_vm1 = vcmask 261120   ;;  %vm297_vm2 = vcmask 781312   ;;  %s1419_s20 = smov 120   ;;  %s1420_s22 = smov 96   ;;  %vm315_vm3 = vcmask 1043456  }
  0x6e   : > { %1054 = vmatprep.subr.bf16.mxu1 %v1417_v0  ;;  %1056 = vmatprep.mubr.msk.bf16.mxu1 %vm1418_vm0, %v1417_v0  ;;  %v235_v4 = vpack.c.bf16 %v234_v3, %v234_v3  ;;  %s1421_s24 = smov 80   ;;  %s1422_s6 = smov 88   ;;  %vm311_vm4 = vcmask 64512   ;;  %vm420_vm5 = vcmask 60416   ;;  %vm547_vm6 = vcmask 126016  }
  0x6f   : > { %1047 = vmatpush3.bf16.msra.mxu0 %v1211_v1  ;;  %s1423_s7 = smov 72   ;;  %s1424_s8 = smov 112   ;;  %vm674_vm7 = vcmask 191616   ;;  %vm801_vm8 = vcmask 257216  }
  0x70   : > { %1048 = vmatprep.subr.bf16.mxu0 %v1417_v0  ;;  %s1425_s26 = smov 104   ;;  %s1426_s29 = smov 56  }
  0x71   : > { %s1427_s11 = smov 64   ;;  %s1428_s30 = smov 40  }
  0x72   : > { %s1429_s4 = smov 48   ;;  %s1430_s5 = smov 8  }
  0x73   : > { %1049 = vmatpush3.bf16.msra.mxu0 %v1212_v2  ;;  %s1431_s21 = smov 16   ;;  %s1432_s25 = smov 24  }
  0x74   : > { %1066 = vmatprep.subr.bf16.mxu0 %v1417_v0  ;;  %s1018_s28 = sshll.u32 %s1402_s15, 7  ;;  %p1797_p12 = scmp.ne.s32.totalorder %s1793_s27, 0 }
  0x76   : > { %1051 = vmatmul.mubr.msk.bf16.vlgmr.msra.gmra.mrb[0].mxu0 %vm252_vm1, %v235_v4 }
  0x77   : > { %1068 = vmatprep.mubr.msk.bf16.mxu0 %vm1418_vm0, %v1417_v0 }
 0x149   : > { %v290_v5 = vpop.f32.mrb[0].mxu0 }
 0x14a   : > { %v296_v6 = vpack.c.bf16 %v290_v5, %v290_v5  ;;  %v1052_v7 = vpop.f32.mrb[1].mxu0 }
 0x14b   : > { %v293_v8 = vpop.f32.mrb[2].mxu0 }
 0x14c   : > { %298 = vst.msk [vmem:[#allocation2] sm:$0xf] %vm297_vm2, %v296_v6  ;;  %v1053_v9 = vpop.f32.mrb[3].mxu0 }
 0x153   : > { %v1213_v10 = vld [vmem:[#allocation2] ss:$0 sps:$4 sm:$0xff]  }
 0x154   : > { %v1664_v11 = vld [vmem:[#allocation2] ss:$0 sps:$4 sm:$0xff]   ;;  %427 = vrot.lane.b32.xlu1 %v1213_v10, %s1419_s20  ;;  %s228_s20 = scalar_lea.vmem [#allocation10], %s989_s10  ;;  %s1433_s10 = smov [#allocation10]  }
 0x155   : > { %309 = vrot.lane.b32.xlu0 %v1664_v11, %s1420_s22  ;;  %v1667_v12 = vld [vmem:[#allocation2] ss:$0 sps:$4 sm:$0xff]   ;;  %s880_s22 = sshll.u32 %s228_s20, 4  ;;  %s1731_s22 = int_to_ptr.vmem [resolvable:$true] %s880_s22 }
 0x156   : > { %v1216_v13 = vld [vmem:[#allocation2] ss:$0 sps:$4 sm:$0xff]   ;;  %s1324_s15 = scalar_lea.vmem %s1731_s22, 128 }
 0x157   : > { %v1670_v14 = vld [vmem:[#allocation2] ss:$0 sps:$4 sm:$0xff]   ;;  %p1325_p8 = scmp.ne.s32.totalorder %s1731_s22, %s1324_s15 }
 0x158   : > { %559 = vrot.lane.b32.xlu1 %v1667_v12, %s1421_s24  ;;  %v1218_v15 = vld [vmem:[#allocation2] ss:$0 sps:$4 sm:$0xff]  }
 0x159   : > { %432 = vrot.lane.b32.xlu0 %v1216_v13, %s1422_s6  ;;  %v1219_v16 = vld [vmem:[#allocation2] ss:$0 sps:$4 sm:$0xff]   ;;  %p1326_p1 = pnand %p1325_p8, %p1797_p12 }
 0x15a   : > { %v304_v21 = vld [vmem:[#allocation2] sm:$0xf] }
 0x15b   : > { %p1327_p10 = pneg %p1326_p1 }
 0x15c   : > { %686 = vrot.lane.b32.xlu1 %v1670_v14, %s1423_s7  ;;  %s1729_s7 = scalar_lea.hbm %s1782_s3, %s1018_s28 }
 0x15d   : > { %554 = vrot.lane.b32.xlu0 %v1218_v15, %s1424_s8  ;;  %s866_s8 = scalar_lea.sflag [#allocation6], %s1639_s9 }
 0x161   : > { %681 = vrot.lane.b32.xlu0 %v1219_v16, %s1425_s26  ;;  %s1328_s26 = sshll.u32 %s1433_s10, 4  ;;  %s1329_s26 = int_to_ptr.vmem [resolvable:$false] %s1328_s26 }
 0x162   : > { %p1331_p3 = scmp.lt.s32.totalorder %s1731_s22, %s1329_s26 }
 0x1c6   : > { %v428_v17 = vpop.permute.xlu1 %427 }
 0x1c7   : > { %v310_v18 = vpop.permute.xlu0 %309 }
 0x1c8   : > { %v317_v19 = vsel %vm315_vm3, %v310_v18, 0 }
 0x1c9   : > { %1055 = vmatpush3.bf16.msra.mxu1 %v317_v19 }
 0x1ca   : > { %1060 = vmatprep.subr.bf16.mxu1 %v1417_v0  ;;  %v560_v23 = vpop.permute.xlu1 %559 }
 0x1cb   : > { %v433_v20 = vpop.permute.xlu0 %432  ;;  %v565_v24 = vsel %vm315_vm3, %v560_v23, 0 }
 0x1cc   : > { %v438_v22 = vsel %vm315_vm3, %v433_v20, 0  ;;  %1057 = vmatmul.mubr.msk.bf16.vlgmr.msra.gmra.mrb[0].mxu1 %vm311_vm4, %v304_v21 }
 0x1cd   : > { %1067 = vmatpush3.bf16.msra.mxu0 %v438_v22  ;;  %1062 = vmatprep.mubr.msk.bf16.mxu1 %vm1418_vm0, %v1417_v0 }
 0x1ce   : > { %1078 = vmatprep.subr.bf16.mxu0 %v1417_v0  ;;  %v687_v25 = vpop.permute.xlu1 %686 }
 0x1cf   : > { %v555_v26 = vpop.permute.xlu0 %554  ;;  %v692_v27 = vsel %vm315_vm3, %v687_v25, 0 }
 0x1d0   : > { %1069 = vmatmul.mubr.msk.bf16.vlgmr.msra.gmra.mrb[4].mxu0 %vm311_vm4, %v428_v17 }
 0x1d1   : > { %1079 = vmatpush3.bf16.msra.mxu0 %v565_v24  ;;  %1080 = vmatprep.mubr.msk.bf16.mxu0 %vm1418_vm0, %v1417_v0 }
 0x1d2   : > { %1090 = vmatprep.subr.bf16.mxu0 %v1417_v0 }
 0x1d3   : > { %v682_v28 = vpop.permute.xlu0 %681 }
 0x1d8   : > { %1081 = vmatmul.mubr.msk.bf16.vlgmr.msra.gmra.mrb[8].mxu0 %vm311_vm4, %v555_v26 }
 0x1d9   : > { %1091 = vmatpush3.bf16.msra.mxu0 %v692_v27  ;;  %1092 = vmatprep.mubr.msk.bf16.mxu0 %vm1418_vm0, %v1417_v0 }
 0x1da   : > { %1102 = vmatprep.subr.bf16.mxu0 %v1417_v0 }
 0x1e0   : > { %1093 = vmatmul.mubr.msk.bf16.vlgmr.msra.gmra.mrb[12].mxu0 %vm311_vm4, %v682_v28 }
 0x1e1   : > { %1106 = vmatprep.mubr.msk.bf16.mxu0 %vm1418_vm0, %v1417_v0 }
 0x29f   : > { %v353_v29 = vpop.f32.mrb[0].mxu1 }
 0x2a0   : > { %v1058_v30 = vpop.f32.mrb[1].mxu1  ;;  %v359_v31 = vsel %vm311_vm4, %v353_v29, -inf }
 0x2a1   : > { %360 = vmax.xlane.f32.xlu1 %v359_v31  ;;  %v356_v32 = vpop.f32.mrb[2].mxu1 }
 0x2a2   : > { %v1059_v33 = vpop.f32.mrb[3].mxu1 }
 0x2a3   : > { %v474_v34 = vpop.f32.mrb[4].mxu0 }
 0x2a4   : > { %v1070_v35 = vpop.f32.mrb[5].mxu0  ;;  %v480_v36 = vsel %vm311_vm4, %v474_v34, -inf }
 0x2a5   : > { %481 = vmax.xlane.f32.xlu0 %v480_v36  ;;  %v477_v37 = vpop.f32.mrb[6].mxu0 }
 0x2a6   : > { %v1071_v38 = vpop.f32.mrb[7].mxu0 }
 0x2ab   : > { %v601_v39 = vpop.f32.mrb[8].mxu0 }
 0x2ac   : > { %v1082_v40 = vpop.f32.mrb[9].mxu0  ;;  %v607_v41 = vsel %vm311_vm4, %v601_v39, -inf }
 0x2ad   : > { %608 = vmax.xlane.f32.xlu0 %v607_v41  ;;  %v604_v42 = vpop.f32.mrb[10].mxu0  ;;  %v1220_v40 = vld [vmem:[#allocation9] sm:$0xff]  }
 0x2ae   : > { %v1083_v43 = vpop.f32.mrb[11].mxu0  ;;  %1103 = vmatpush3.bf16.msra.mxu0 %v1220_v40 }
 0x2af   : > { %1104 = vmatprep.subr.bf16.mxu0 %v1417_v0 }
 0x2b2   : > { %487 = vrot.lane.b32.xlu1 %v1216_v13, %s1426_s29  ;;  %s1330_s29 = scalar_lea.vmem %s1329_s26, 256 }
 0x2b3   : > { %v728_v44 = vpop.f32.mrb[12].mxu0  ;;  %p1332_p5 = scmp.lt.s32.totalorder %s1330_s29, %s1324_s15 }
 0x2b4   : > { %v1094_v45 = vpop.f32.mrb[13].mxu0  ;;  %v734_v48 = vsel %vm311_vm4, %v728_v44, -inf }
 0x2b5   : > { %v731_v46 = vpop.f32.mrb[14].mxu0  ;;  %p1333_p9 = por %p1332_p5, %p1331_p3 }
 0x2b6   : > { %v1095_v47 = vpop.f32.mrb[15].mxu0 }
 0x2b7   : > { %p1334_p11 = pnand %p1333_p9, %p1327_p10 }
 0x2c3   : > { %366 = vrot.lane.b32.xlu0 %v1664_v11, %s1427_s11 }
 0x2c7   : > { %741 = vrot.lane.b32.xlu0 %v1670_v14, %s1428_s30 }
 0x2d6   : > { %735 = vmax.xlane.f32.xlu1 %v734_v48 }
 0x2e7   : > { %614 = vrot.lane.b32.xlu1 %v1667_v12, %s1429_s4 }
 0x32e   : > { %v361_v49 = vpop.xlane.xlu1 %360 }
 0x32f   : > { %v362_v50 = vsub.f32 %v353_v29, %v361_v49 }
 0x331   : > { %v363_v51 = vmul.f32 1.442695, %v362_v50 }
 0x332   : > { %v482_v52 = vpop.xlane.xlu0 %481  ;;  %v488_v61 = vpop.permute.xlu1 %487 }
 0x333   : > { %v483_v53 = vsub.f32 %v474_v34, %v482_v52  ;;  %1222 = vpow2.f32 %v363_v51  ;;  %v493_v2 = vsel %vm315_vm3, %v488_v61, 0 }
 0x335   : > { %v484_v54 = vmul.f32 1.442695, %v483_v53 }
 0x337   : > { %1224 = vpow2.f32 %v484_v54 }
 0x33a   : > { %v609_v55 = vpop.xlane.xlu0 %608 }
 0x33b   : > { %v610_v56 = vsub.f32 %v601_v39, %v609_v55 }
 0x33d   : > { %v611_v57 = vmul.f32 1.442695, %v610_v56  ;;  %v1223_v58 = vpop.eup %1222 }
 0x33e   : > { %v367_v59 = vpop.permute.xlu0 %366  ;;  %v365_v63 = vpack.c.bf16 %v1223_v58, %v1223_v58  ;;  %v414_v3 = vsel %vm311_vm4, %v1223_v58, 0.0 }
 0x33f   : > { %1226 = vpow2.f32 %v611_v57  ;;  %v372_v60 = vsel %vm315_vm3, %v367_v59, 0 }
 0x340   : > { %1061 = vmatpush3.bf16.msra.mxu1 %v372_v60 }
 0x341   : > { %v1225_v62 = vpop.eup %1224  ;;  %1072 = vmatprep.subr.bf16.mxu1 %v1417_v0 }
 0x342   : > { %v535_v1 = vsel %vm311_vm4, %v1225_v62, 0.0  ;;  %v486_v5 = vpack.c.bf16 %v1225_v62, %v1225_v62  ;;  %v742_v12 = vpop.permute.xlu0 %741 }
 0x343   : > { %1063 = vmatmul.mubr.msk.bf16.vlgmr.msra.gmra.mrb[4].mxu1 %vm311_vm4, %v365_v63  ;;  %536 = vadd.xlane.f32.xlu1 %v535_v1  ;;  %v747_v14 = vsel %vm315_vm3, %v742_v12, 0 }
 0x344   : > { %1073 = vmatpush3.bf16.msra.mxu1 %v493_v2  ;;  %1074 = vmatprep.mubr.msk.bf16.mxu1 %vm1418_vm0, %v1417_v0 }
 0x345   : > { %1084 = vmatprep.subr.bf16.mxu1 %v1417_v0 }
 0x347   : > { %415 = vadd.xlane.f32.xlu1 %v414_v3 }
 0x349   : > { %v1227_v4 = vpop.eup %1226 }
 0x34a   : > { %v662_v6 = vsel %vm311_vm4, %v1227_v4, 0.0  ;;  %v613_v13 = vpack.c.bf16 %v1227_v4, %v1227_v4 }
 0x34b   : > { %663 = vadd.xlane.f32.xlu0 %v662_v6  ;;  %1075 = vmatmul.mubr.msk.bf16.vlgmr.msra.gmra.mrb[8].mxu1 %vm311_vm4, %v486_v5 }
 0x34c   : > { %1086 = vmatprep.mubr.msk.bf16.mxu1 %vm1418_vm0, %v1417_v0 }
 0x363   : > { %v736_v7 = vpop.xlane.xlu1 %735 }
 0x364   : > { %v737_v8 = vsub.f32 %v728_v44, %v736_v7  ;;  %v1221_v44 = vld [vmem:[#allocation9 + $0x8] sm:$0xff]  }
 0x365   : > { %1105 = vmatpush3.bf16.msra.mxu0 %v1221_v44 }
 0x366   : > { %v738_v9 = vmul.f32 1.442695, %v737_v8 }
 0x367   : > { %v615_v10 = vpop.permute.xlu1 %614 }
 0x368   : > { %1228 = vpow2.f32 %v738_v9  ;;  %v620_v11 = vsel %vm315_vm3, %v615_v10, 0 }
 0x369   : > { %1085 = vmatpush3.bf16.msra.mxu1 %v620_v11 }
 0x36a   : > { %1096 = vmatprep.subr.bf16.mxu1 %v1417_v0 }
 0x36c   : > { %1087 = vmatmul.mubr.msk.bf16.vlgmr.msra.gmra.mrb[12].mxu1 %vm311_vm4, %v613_v13 }
 0x36d   : > { %1097 = vmatpush3.bf16.msra.mxu1 %v747_v14  ;;  %1098 = vmatprep.mubr.msk.bf16.mxu1 %vm1418_vm0, %v1417_v0 }
 0x372   : > { %v1229_v15 = vpop.eup %1228 }
 0x373   : > { %v789_v16 = vsel %vm311_vm4, %v1229_v15, 0.0  ;;  %v740_v17 = vpack.c.bf16 %v1229_v15, %v1229_v15 }
 0x374   : > { %790 = vadd.xlane.f32.xlu0 %v789_v16 }
 0x375   : > { %1099 = vmatmul.mubr.msk.bf16.vlgmr.msra.gmra.mrb[16].mxu1 %vm311_vm4, %v740_v17 }
 0x3d0   : > { %v537_v18 = vpop.xlane.xlu1 %536 }
 0x3d4   : > { %v416_v19 = vpop.xlane.xlu1 %415 }
 0x3d5   : > { %1230 = vrcp.f32 %v416_v19 }
 0x3d6   : > { %1232 = vrcp.f32 %v537_v18 }
 0x3d8   : > { %v664_v34 = vpop.xlane.xlu0 %663 }
 0x3d9   : > { %1234 = vrcp.f32 %v664_v34 }
 0x3df   : > { %v1231_v20 = vpop.eup %1230 }
 0x3e0   : > { %v1233_v27 = vpop.eup %1232 }
 0x3e3   : > { %v1235_v36 = vpop.eup %1234 }
 0x401   : > { %v791_v35 = vpop.xlane.xlu0 %790 }
 0x402   : > { %1236 = vrcp.f32 %v791_v35 }
 0x40c   : > { %v1237_v45 = vpop.eup %1236 }
 0x416   : > { %v408_v21 = vpop.f32.mrb[4].mxu1 }
 0x417   : > { %v418_v22 = vmul.f32 %v1231_v20, %v408_v21  ;;  %v1064_v23 = vpop.f32.mrb[5].mxu1 }
 0x418   : > { %v411_v24 = vpop.f32.mrb[6].mxu1 }
 0x419   : > { %v419_v25 = vpack.c.bf16 %v418_v22, %v418_v22  ;;  %v1065_v26 = vpop.f32.mrb[7].mxu1 }
 0x41b   : > { %421 = vst.msk [vmem:[#allocation3] sm:$0xf] %vm420_vm5, %v419_v25 }
 0x41e   : > { %v529_v28 = vpop.f32.mrb[8].mxu1 }
 0x41f   : > { %v539_v29 = vmul.f32 %v1233_v27, %v529_v28  ;;  %v1076_v30 = vpop.f32.mrb[9].mxu1 }
 0x420   : > { %v532_v31 = vpop.f32.mrb[10].mxu1 }
 0x421   : > { %v1021_v32 = vpack.c.bf16 %v539_v29, %v539_v29  ;;  %v1077_v33 = vpop.f32.mrb[11].mxu1 }
 0x423   : > { %544 = vrot.lane.b32.xlu0 %v1021_v32, %s1430_s5 }
 0x43f   : > { %v656_v37 = vpop.f32.mrb[12].mxu1 }
 0x440   : > { %v666_v38 = vmul.f32 %v1235_v36, %v656_v37  ;;  %v1088_v39 = vpop.f32.mrb[13].mxu1 }
 0x441   : > { %v659_v41 = vpop.f32.mrb[14].mxu1 }
 0x442   : > { %v1022_v42 = vpack.c.bf16 %v666_v38, %v666_v38  ;;  %v1089_v43 = vpop.f32.mrb[15].mxu1 }
 0x444   : > { %671 = vrot.lane.b32.xlu1 %v1022_v42, %s1431_s21 }
 0x448   : > { %v783_v46 = vpop.f32.mrb[16].mxu1 }
 0x449   : > { %v793_v47 = vmul.f32 %v1237_v45, %v783_v46  ;;  %v1100_v48 = vpop.f32.mrb[17].mxu1 }
 0x44a   : > { %v786_v49 = vpop.f32.mrb[18].mxu1 }
 0x44b   : > { %v1023_v50 = vpack.c.bf16 %v793_v47, %v793_v47  ;;  %v1101_v51 = vpop.f32.mrb[19].mxu1 }
 0x44d   : > { %798 = vrot.lane.b32.xlu1 %v1023_v50, %s1432_s25 }
 0x495   : > { %v545_v52 = vpop.permute.xlu0 %544 }
 0x496   : > { %548 = vst.msk [vmem:[#allocation3] sm:$0xf] %vm547_vm6, %v545_v52 }
 0x4b6   : > { %v672_v53 = vpop.permute.xlu1 %671 }
 0x4b7   : > { %675 = vst.msk [vmem:[#allocation3] sm:$0xf] %vm674_vm7, %v672_v53 }
 0x4bf   : > { %v799_v0 = vpop.permute.xlu1 %798 }
 0x4c0   : > { %802 = vst.msk [vmem:[#allocation3] sm:$0xf] %vm801_vm8, %v799_v0 }
 0x4c7   : > { %v803_v54 = vld [vmem:[#allocation3] sm:$0xf] }
 0x4c8   : > { %1107 = vmatmul.mubr.msk.bf16.vlgmr.msra.gmra.mrb[16].mxu0 %vm252_vm1, %v803_v54 }
 0x59b   : > { %v858_v55 = vpop.f32.mrb[16].mxu0 }
 0x59c   : > { %864 = vst.msk [vmem:[%s228_s20] sm:$0xff] %vm252_vm1, %v858_v55  ;;  %v1108_v56 = vpop.f32.mrb[17].mxu0 }
 0x59d   : > { %v861_v57 = vpop.f32.mrb[18].mxu0 }
 0x59e   : > { %1337 = shalt.err (!%p1334_p11)
}
 0x59f   : > { %s1338_s9 = scalar_lea.hbm %s1729_s7, 128  ;;  %s1342_s4 = scalar_lea.hbm %s1782_s3, 256 }
 0x5a0   : > { %p1339_p0 = scmp.ne.s32.totalorder %s1729_s7, %s1338_s9  ;;  %p1343_p6 = scmp.lt.u32.totalorder %s1729_s7, %s1782_s3 }
 0x5a1   : > { %p1344_p7 = scmp.lt.u32.totalorder %s1342_s4, %s1338_s9  ;;  %p1346_p8 = scmp.lt.u32.totalorder %s1338_s9, %s1729_s7 }
 0x5a2   : > { %p1340_p4 = pnand %p1339_p0, %p1797_p12 }
 0x5a3   : > { %p1345_p2 = por %p1344_p7, %p1343_p6 }
 0x5a4   : > { %p1341_p13 = pneg %p1340_p4 }
 0x5a5   : > { %p1347_p1 = por %p1346_p8, %p1345_p2 }
 0x5a7   : > { %p1348_p10 = pnand %p1347_p1, %p1341_p13 }
 0x5a9   : > { %1351 = shalt.err (!%p1348_p10)
}
 0x5aa   : > { %1120 = dma.vmem_to_hbm [thread:$0]  (%p1797_p12), %s1731_s22, 128, %s1729_s7, %s866_s8   ;;  %v1109_v58 = vpop.f32.mrb[19].mxu0 }
 0x5ab PF: > { %s892_s25 = sand.u32 1, %s1390_s12   ;;  %p1798_p3 = scmp.ne.s32.totalorder %s1790_s23, 0 }
 0x5ac   : > { %p1799_p5 = scmp.ge.s32.totalorder %s1410_s17, 2  ;;  %s893_s28 = scalar_lea.sflag [#allocation6], %s892_s25 }
 0x5ae   : > { %p1134_p9 = pnand %p1799_p5, %p1798_p3 }
 0x5b0   : > { %1385 = dma.done.wait (!%p1134_p9), %s893_s28, 128  }
 0x5b1   : > { %1387 = vsyncadd (!%p1134_p9), %s893_s28, 4294967168  ;;  %s20_s17 = sadd.s32 1, %s1410_s17   ;;  %s1800_s12 = smov %s1394_s13 }
 0x5b2   : > { %p17_p11 = scmp.ge.s32.totalorder %s20_s17, 4   ;;  %s1801_s13 = smov %s1398_s14 }
 0x5b3   : > { %s1802_s14 = smov %s1596_s18  ;;  %s1803_s15 = smov %s1406_s16 }
 0x5b4   : > { %s1804_s16 = smov %s1806_s19  ;;  %19 = sbr.rel (!%p17_p11) target bundleno = 7 (0x7), region = 90 }
 0x5bb   :  { %898 = vsyncpa [#allocation5], 1 }
 0x5bc   :  { %900 = vsyncpa [#allocation5 + $0x1], 1 }
 0x5bd   :  { %901 = vsyncpa [#allocation8], 1 }
 0x5be   :  { %902 = vsyncpa [#allocation6], 1 }
 0x5bf   :  { %904 = vsyncpa [#allocation6 + $0x1], 1 }

</bundles_post_ra>
